<compile_context>
chip_gen: v6e
topology: v6e:2x2x1
jax: 0.10.0
libtpu: 0.0.40
codegen_flags: <defaults>
</compile_context>

<pallas_src>
import jax
import jax.numpy as jnp
from jax import lax
from jax.experimental import pallas as pl
from jax.experimental.pallas import tpu as pltpu

OUT_SUB = 16      # out-features padded to a sublane-friendly size (>= 10)
TM_MAX = 512      # batch tile (multiple of 8); sized for v7x 64 MiB VMEM budget


def fused_kernel(x_ref, w_ref, b_ref, o_ref):
    # x_ref : (TM, K)       bf16   K = C_in * H * W
    # w_ref : (OUT_SUB, K)  bf16   effective (conv ∘ linear) weight, natural layout
    # b_ref : (1, OUT_SUB)  f32    effective bias
    # o_ref : (TM, OUT_SUB) f32
    acc = lax.dot_general(
        x_ref[...], w_ref[...],
        dimension_numbers=(((1,), (1,)), ((), ())),   # contract on K (rhs transposed)
        preferred_element_type=jnp.float32,
    )
    o_ref[...] = acc + b_ref[...]


def build_fused_params(w_ct, b_ct, w_lin, b_lin, H, W):
    """Fold the 1x1 ConvTranspose into the Linear. Call ONCE for static weights."""
    C_in, C_out = w_ct.shape[0], w_ct.shape[1]
    OUT = w_lin.shape[0]
    HW = H * W
    K = C_in * HW

    wct2 = w_ct[:, :, 0, 0].astype(jnp.float32)                 # (C_in, C_out)
    wlin3 = w_lin.reshape(OUT, C_out, HW).astype(jnp.float32)   # (OUT, C_out, HW)
    # W_eff[t, ci, hw] = sum_co wct2[ci, co] * wlin3[t, co, hw]
    w_eff = jnp.einsum("ic,tch->tih", wct2, wlin3).reshape(OUT, K)
    b_eff = (
        jnp.einsum("c,tch->t", b_ct.astype(jnp.float32), wlin3)
        + b_lin.astype(jnp.float32)
    )

    # Pad only the (small) out dimension to a sublane multiple; weight in bf16.
    w_eff_p = (
        jnp.zeros((OUT_SUB, K), jnp.bfloat16).at[:OUT, :].set(w_eff.astype(jnp.bfloat16))
    )
    b_eff_p = jnp.zeros((1, OUT_SUB), jnp.float32).at[0, :OUT].set(b_eff)
    return w_eff_p, b_eff_p


def model_forward(x_nchw, w_eff_p, b_eff_p, out_features):
    """x_nchw: (N, C_in, H, W) float32.  Returns (N, out_features) float32."""
    N, C_in, H, W = x_nchw.shape
    K = C_in * H * W

    # Flatten in (ci, h, w) order — matches how w_eff was built — and cast to bf16.
    x_flat = x_nchw.reshape(N, K).astype(jnp.bfloat16)

    # Batch tile: one grid step at toy sizes, parallel grid at realistic N.
    tm = N if N <= TM_MAX else TM_MAX
    n_pad = pl.cdiv(N, tm) * tm
    if n_pad != N:
        x_flat = jnp.pad(x_flat, ((0, n_pad - N), (0, 0)))
    grid = (n_pad // tm,)

    cost = pl.CostEstimate(
        flops=2 * n_pad * K * OUT_SUB,
        transcendentals=0,
        bytes_accessed=2 * (x_flat.size + w_eff_p.size)
        + 4 * (b_eff_p.size + n_pad * OUT_SUB),
    )

    out_p = pl.pallas_call(
        fused_kernel,
        out_shape=jax.ShapeDtypeStruct((n_pad, OUT_SUB), jnp.float32),
        grid_spec=pltpu.PrefetchScalarGridSpec(
            num_scalar_prefetch=0,
            grid=grid,
            in_specs=[
                pl.BlockSpec((tm, K), lambda i: (i, 0)),        # x: tiled on batch
                pl.BlockSpec((OUT_SUB, K), lambda i: (0, 0)),   # weight: resident
                pl.BlockSpec((1, OUT_SUB), lambda i: (0, 0)),   # bias:   resident
            ],
            out_specs=pl.BlockSpec((tm, OUT_SUB), lambda i: (i, 0)),
        ),
        compiler_params=pltpu.CompilerParams(
            dimension_semantics=("parallel",),
        ),
        cost_estimate=cost,
    )(x_flat, w_eff_p, b_eff_p)

    return out_p[:N, :out_features]


def reference_forward(x_nchw, w_ct, b_ct, w_lin, b_lin):
    # Pure-JAX f32 reference mirroring the PyTorch forward (two-stage, unfused).
    N = x_nchw.shape[0]
    v1 = (
        jnp.einsum("nchw,co->nohw", x_nchw, w_ct[:, :, 0, 0])
        + b_ct[None, :, None, None]
    )
    v2 = v1.reshape(N, -1)
    return v2 @ w_lin.T + b_lin[None, :]


if __name__ == "__main__":
    # Small shapes consistent with the forward: batch=2, channels=3, spatial=16.
    N, C_in, C_out, H, W, OUT = 2, 3, 1, 16, 16, 10
    key = jax.random.PRNGKey(0)
    k_x, k_wc, k_bc, k_wl, k_bl = jax.random.split(key, 5)

    x = jax.random.normal(k_x, (N, C_in, H, W), dtype=jnp.float32)
    # ConvTranspose2d(3, 1, 1) weight shape: (in_channels, out_channels, 1, 1)
    w_ct = jax.random.normal(k_wc, (C_in, C_out, 1, 1), dtype=jnp.float32) * 0.1
    b_ct = jax.random.normal(k_bc, (C_out,), dtype=jnp.float32) * 0.1
    # Linear(in_features = C_out*H*W, 10) weight shape: (OUT, in_features)
    w_lin = jax.random.normal(k_wl, (OUT, C_out * H * W), dtype=jnp.float32) * 0.05
    b_lin = jax.random.normal(k_bl, (OUT,), dtype=jnp.float32) * 0.05

    # Precompute + cache the fused, padded, bf16 weight ONCE (static weights).
    w_eff_p, b_eff_p = build_fused_params(w_ct, b_ct, w_lin, b_lin, H, W)
    w_eff_p, b_eff_p = jax.block_until_ready((w_eff_p, b_eff_p))

    out = model_forward(x, w_eff_p, b_eff_p, OUT)
    out = jax.block_until_ready(out)

    ref = reference_forward(x, w_ct, b_ct, w_lin, b_lin)
    assert out.shape == (N, OUT)
    # bf16 weight/activation (f32 accumulation) -> loosen tolerance vs f32 reference.
    assert jnp.allclose(out, ref, atol=2e-2, rtol=2e-2), "mismatch vs reference"

    print("KERNEL_OK")
</pallas_src>

<mosaic_0001>
module attributes {stable_mosaic.version = 11 : i64} {
  func.func @fused_kernel(%arg0: i32, %arg1: memref<2x768xbf16, #tpu.memory_space<vmem>>, %arg2: memref<16x768xbf16, #tpu.memory_space<vmem>>, %arg3: memref<1x16xf32, #tpu.memory_space<vmem>>, %arg4: memref<2x16xf32, #tpu.memory_space<vmem>>) attributes {dimension_semantics = [#tpu.dimension_semantics<parallel>], iteration_bounds = array<i64: 1>, scalar_prefetch = 0 : i64, scratch_operands = 0 : i64, tpu.core_type = #tpu.core_type<tc>, window_params = [{transform_indices = @transform_0, window_bounds = array<i64: 2, 768>}, {pipeline_mode = #tpu.pipeline_mode<synchronous>, transform_indices = @transform_1, window_bounds = array<i64: 16, 768>}, {pipeline_mode = #tpu.pipeline_mode<synchronous>, transform_indices = @transform_2, window_bounds = array<i64: 1, 16>}, {transform_indices = @transform_3, window_bounds = array<i64: 2, 16>}]} {
    %c0 = arith.constant 0 : index
    %c0_0 = arith.constant 0 : index
    %0 = vector.load %arg1[%c0, %c0_0] : memref<2x768xbf16, #tpu.memory_space<vmem>>, vector<2x768xbf16>
    %c0_1 = arith.constant 0 : index
    %c0_2 = arith.constant 0 : index
    %1 = vector.load %arg2[%c0_1, %c0_2] : memref<16x768xbf16, #tpu.memory_space<vmem>>, vector<16x768xbf16>
    %cst = arith.constant dense<0.000000e+00> : vector<2x16xf32>
    %2 = tpu.matmul %0, %1, %cst {dimension_numbers = #tpu.dot_dimension_numbers<[1], [1], [0], [0], [0, 0, 1, 0], [], []>} : vector<2x768xbf16>, vector<16x768xbf16>, vector<2x16xf32> -> vector<2x16xf32>
    %c0_3 = arith.constant 0 : index
    %c0_4 = arith.constant 0 : index
    %3 = vector.load %arg3[%c0_3, %c0_4] : memref<1x16xf32, #tpu.memory_space<vmem>>, vector<1x16xf32>
    %4 = vector.broadcast %3 : vector<1x16xf32> to vector<2x16xf32>
    %5 = arith.addf %2, %4 : vector<2x16xf32>
    %c0_5 = arith.constant 0 : index
    %c0_6 = arith.constant 0 : index
    %6 = vector.load %arg4[%c0_5, %c0_6] : memref<2x16xf32, #tpu.memory_space<vmem>>, vector<2x16xf32>
    tpu.vector_store %arg4[%c0_5, %c0_6], %5 {strides = array<i32>} : memref<2x16xf32, #tpu.memory_space<vmem>>, vector<2x16xf32>,
    return
  }
  func.func @transform_0(%arg0: i32) -> (i32, i32) {
    %c0_i32 = arith.constant 0 : i32
    %c0_i32_0 = arith.constant 0 : i32
    return %arg0, %c0_i32 : i32, i32
  }
  func.func @transform_1(%arg0: i32) -> (i32, i32) {
    %c0_i32 = arith.constant 0 : i32
    %c0_i32_0 = arith.constant 0 : i32
    %c0_i32_1 = arith.constant 0 : i32
    return %c0_i32, %c0_i32_0 : i32, i32
  }
  func.func @transform_2(%arg0: i32) -> (i32, i32) {
    %c0_i32 = arith.constant 0 : i32
    %c0_i32_0 = arith.constant 0 : i32
    %c0_i32_1 = arith.constant 0 : i32
    return %c0_i32, %c0_i32_0 : i32, i32
  }
  func.func @transform_3(%arg0: i32) -> (i32, i32) {
    %c0_i32 = arith.constant 0 : i32
    %c0_i32_0 = arith.constant 0 : i32
    return %arg0, %c0_i32 : i32, i32
  }
}

</mosaic_0001>

<bundles_post_ra>
// kernel: tpu_custom_call.1
= control target key start
LH: loop header
LB: loop body
LE: loop exit
PB: predicated region body
PF: predicated region fallthrough
CT: control target
= control target key end

     0   :  { %8 = vsyncpa [#allocation3], 0  ;;  %s405_s0 = inlined_call_operand.hbm [shape: bf16[2,768], index: 0, kind: input, shape index: {}]   ;;  %s406_s1 = inlined_call_operand.hbm [shape: bf16[16,768], index: 1, kind: input, shape index: {}]   ;;  %s407_s2 = inlined_call_operand.vmem [shape: f32[1,16], index: 2, kind: input, shape index: {}]   ;;  %s408_s3 = inlined_call_operand.hbm [shape: f32[2,16], index: 3, kind: output, shape index: {}]  }
   0x1   :  { %9 = vsyncpa [#allocation6], 0 }
   0x2   :  { %10 = vsyncpa [#allocation4], 0  ;;  %s367_s12 = smov [#allocation2]   ;;  %s368_s14 = smov [#allocation5]  }
   0x3   :  { %s17_s13 = sshll.u32 %s367_s12, 4  ;;  %s26_s15 = sshll.u32 %s368_s14, 4  ;;  %s18_s13 = int_to_ptr.vmem [resolvable:$true] %s17_s13  ;;  %s27_s15 = int_to_ptr.vmem [resolvable:$true] %s26_s15 }
   0x4   :  { %s309_s16 = scalar_lea.vmem %s18_s13, 96  ;;  %p314_p1 = scmp.lt.s32.totalorder %s18_s13, %s18_s13 }
   0x5   :  { %p310_p0 = scmp.ne.s32.totalorder %s18_s13, %s309_s16  ;;  %p315_p2 = scmp.lt.s32.totalorder %s309_s16, %s309_s16 }
   0x7   :  { %p316_p3 = por %p315_p2, %p314_p1 }
   0x9   :  { %p317_p4 = pnand %p316_p3, %p310_p0 }
   0xb   :  { %320 = shalt.err (!%p317_p4)
}
   0xc   :  { %20 = dma.hbm_to_vmem [thread:$0]  %s405_s0, 96, %s18_s13, [#allocation3]  }
   0xd   :  { %s329_s19 = scalar_lea.vmem %s27_s15, 768  ;;  %p334_p6 = scmp.lt.s32.totalorder %s27_s15, %s27_s15 }
   0xe   :  { %p330_p5 = scmp.ne.s32.totalorder %s27_s15, %s329_s19  ;;  %p335_p7 = scmp.lt.s32.totalorder %s329_s19, %s329_s19 }
  0x10   :  { %p336_p8 = por %p335_p7, %p334_p6 }
  0x12   :  { %p337_p9 = pnand %p336_p8, %p330_p5 }
  0x14   :  { %340 = shalt.err (!%p337_p9)
}
  0x15   :  { %s369_s20 = smov 384   ;;  %s370_s21 = smov 24  }
  0x16   :  { %32 = dma.hbm_to_vmem [thread:$0]  %s406_s1, 768, %s27_s15, [#allocation6], %s369_s20, %s369_s20, %s370_s21  }
  0x17   :  { %361 = dma.done.wait [#allocation3], 96  }
  0x18   :  { %362 = vsyncadd [#allocation3], 4294967200 }
  0x19   :  { %363 = dma.done.wait [#allocation6], 768  }
  0x1a   :  { %364 = vsyncadd [#allocation6], 4294966528  ;;  %v61_v0 = vlaneseq  ;;  %v371_v1 = vmov 1966171168   ;;  %v291_v6 = vld [vmem:[#allocation5 + $0x4] ss:$24 sps:$4 sm:$0xff]  }
  0x1b   :  { %v59_v2 = vunpack.c.l.s4 %v371_v1  ;;  %v293_v7 = vld [vmem:[#allocation5] ss:$24 sps:$4 sm:$0xff]   ;;  %154 = vmatprep.subr.bf16.mxu0 %v291_v6  ;;  %v294_v8 = vld [vmem:[#allocation5 + $0xc] ss:$24 sps:$4 sm:$0xff]   ;;  %v298_v18 = vld [vmem:[#allocation5 + $0x10] ss:$24 sps:$4 sm:$0xff]  }
  0x1c   :  { %v62_v3 = vshrl.u32 %v61_v0, 7  ;;  %v296_v9 = vld [vmem:[#allocation5 + $0x8] ss:$24 sps:$4 sm:$0xff]   ;;  %v42_v10 = vld [vmem:[#allocation2] sm:$0x3f]  ;;  %155 = vmatpush1.bf16.xpose.msra.mxu0 %v293_v7  ;;  %194 = vmatprep.subr.bf16.mxu1 %v294_v8  ;;  %s372_s24 = smov [#allocation7]  }
  0x1d   :  { %v60_v4 = vunpack.c.0.s8 %v59_v2  ;;  %v57_v11 = vcombine.high %v42_v10, %v42_v10  ;;  %v300_v13 = vld [vmem:[#allocation5 + $0x14] ss:$24 sps:$4 sm:$0xff]   ;;  %195 = vmatpush1.bf16.xpose.msra.mxu1 %v296_v9  ;;  %v278_v24 = vld [vmem:[%s407_s2] ss:$0 sm:$0xff]  ;;  %s268_s25 = sshll.u32 %s372_s24, 4  ;;  %vm260_vm0 = vcmask 123904   ;;  %s269_s25 = int_to_ptr.vmem [resolvable:$true] %s268_s25 }
  0x1e   :  { %234 = vmatprep.subr.bf16.mxu0 %v300_v13  ;;  %s341_s2 = scalar_lea.vmem %s269_s25, 32  ;;  %p346_p11 = scmp.lt.s32.totalorder %s269_s25, %s269_s25 }
  0x1f   :  { %v63_v5 = vsub.s32 %v60_v4, %v62_v3  ;;  %p342_p10 = scmp.ne.s32.totalorder %s269_s25, %s341_s2  ;;  %p347_p12 = scmp.lt.s32.totalorder %s341_s2, %s341_s2 }
  0x21   :  { %v64_v12 = vrot.slane %v42_v10, %v63_v5  ;;  %v71_v16 = vrot.slane %v57_v11, %v63_v5  ;;  %p348_p13 = por %p347_p12, %p346_p11 }
  0x23   :  { %v72_v14 = vcombine.high %v64_v12, %v64_v12  ;;  %v80_v15 = vrot.slane %v64_v12, %v63_v5  ;;  %v73_v19 = vcombine.high %v71_v16, %v71_v16  ;;  %v87_v23 = vrot.slane %v71_v16, %v63_v5  ;;  %p349_p0 = pnand %p348_p13, %p342_p10 }
  0x25   :  { %v94_v17 = vrot.slane %v72_v14, %v63_v5  ;;  %v102_v20 = vcombine.high %v80_v15, %v80_v15  ;;  %v101_v22 = vrot.slane %v73_v19, %v63_v5 }
  0x27   :  { %172 = vmatprep.mubr.bf16.mxu0 %v94_v17  ;;  %v103_v21 = vcombine.high %v94_v17, %v94_v17 }
  0x28   :  { %173 = vmatmul.mubr.bf16.vlgmr.msra.gmra.mxu0 %v80_v15 }
  0x29   :  { %235 = vmatpush1.bf16.xpose.msra.mxu0 %v298_v18  ;;  %212 = vmatprep.mubr.bf16.mxu1 %v103_v21 }
  0x2a   :  { %213 = vmatmul.mubr.bf16.vlgmr.msra.gmra.mxu1 %v102_v20  ;;  %252 = vmatprep.mubr.bf16.mxu0 %v101_v22 }
  0x30   :  { %253 = vmatmul.mubr.bf16.vlgmr.msra.gmra.mxu0 %v87_v23 }
  0xe8   :  { %v174_v25 = vpop.f32.mrf.mxu0 }
  0xe9   :  { %v175_v28 = vadd.f32 %v278_v24, %v174_v25 }
  0xea   :  { %v176_v26 = vpop.f32.mrf.mxu0  ;;  %v214_v27 = vpop.f32.mrf.mxu1 }
  0xeb   :  { %v215_v33 = vadd.f32 %v214_v27, %v175_v28 }
  0xec   :  { %v177_v29 = vpop.f32.mrf.mxu0  ;;  %v216_v30 = vpop.f32.mrf.mxu1 }
  0xee   :  { %v178_v31 = vpop.f32.mrf.mxu0  ;;  %v217_v32 = vpop.f32.mrf.mxu1 }
  0xf0   :  { %v254_v34 = vpop.f32.mrf.mxu0  ;;  %v218_v35 = vpop.f32.mrf.mxu1 }
  0xf1   :  { %v255_v36 = vadd.f32 %v254_v34, %v215_v33 }
  0xf2   :  { %v256_v37 = vpop.f32.mrf.mxu0 }
  0xf3   :  { %261 = vst.msk [vmem:[#allocation7] sm:$0x3] %vm260_vm0, %v255_v36 }
  0xf4   :  { %v257_v38 = vpop.f32.mrf.mxu0 }
  0xf5   :  { %352 = shalt.err (!%p349_p0)
}
  0xf6   :  { %271 = dma.vmem_to_hbm [thread:$0]  %s269_s25, 32, %s408_s3, [#allocation4]   ;;  %v258_v39 = vpop.f32.mrf.mxu0 }
  0xf7   :  { %365 = dma.done.wait [#allocation4], 32  }
  0xf8   :  { %366 = vsyncadd [#allocation4], 4294967264 }
  0xf9   :  { %275 = vsyncpa [#allocation3], 1 }
  0xfa   :  { %276 = vsyncpa [#allocation6], 1 }
  0xfb   :  { %277 = vsyncpa [#allocation4], 1 }

</bundles_post_ra>
